<compile_context>
chip_gen: v7x
topology: tpu7x:2x2x1
jax: 0.10.0
libtpu: 0.0.40
codegen_flags: <defaults>
</compile_context>

<pallas_src>
import jax
import jax.numpy as jnp
from jax.experimental import pallas as pl
from jax.experimental.pallas import tpu as pltpu


def _mlp_kernel(xt_ref,
                w1t_ref, b1_ref,
                w2t_ref, b2_ref,
                w34t_ref, b34_ref,
                o_ref):
    """Feature-major MLP tile: activations are (features, batch_tile)."""
    xt = xt_ref[...]                     # (in_dim, TB)

    # Hoisted bias loads (broadcast along lanes).
    b1 = b1_ref[...]                     # (64, 1)
    b2 = b2_ref[...]                     # (32, 1)
    b34 = b34_ref[...]                   # (out_dim, 1)

    # linear1 + relu
    h = jnp.dot(w1t_ref[...], xt, preferred_element_type=jnp.float32) + b1
    h = jnp.maximum(h, 0.0)

    # linear2 + sigmoid  (the following ReLU is the identity -> removed)
    h = jnp.dot(w2t_ref[...], h, preferred_element_type=jnp.float32) + b2
    h = jax.nn.sigmoid(h)

    # linear3 and linera4 fused into a single projection (w34 = w3 @ w4).
    y = jnp.dot(w34t_ref[...], h, preferred_element_type=jnp.float32) + b34

    o_ref[...] = y.astype(o_ref.dtype)   # (out_dim, TB): lane-dense store


def _round_up(n, m):
    return ((n + m - 1) // m) * m


def mymodel_forward(x, params, *, max_tb=512):
    """x: (B, input_dim) float32.
    params: weights stored as (in, out), biases as (1, out) (transposed vs PyTorch)."""
    B, in_dim = x.shape
    out_dim = params["w4"].shape[1]

    # --- host-side algebraic fusion of linear3 -> linera4 (exact) ---
    w34 = params["w3"] @ params["w4"]                  # (32, out)
    b34 = params["b3"] @ params["w4"] + params["b4"]   # (1, out)

    # Feature-major (transposed) weights/biases so batch lives on lanes.
    w1t, b1t = params["w1"].T, params["b1"].T          # (64, in), (64, 1)
    w2t, b2t = params["w2"].T, params["b2"].T          # (32, 64), (32, 1)
    w34t, b34t = w34.T, b34.T                          # (out, 32), (out, 1)

    # Batch tile: multiple of 128 lanes; pad batch up to a whole number of tiles.
    tb = max_tb if B >= max_tb else _round_up(B, 128)
    b_pad = _round_up(B, tb)
    n_tiles = b_pad // tb

    # Layout plumbing (wrapper-side): present x as (in_dim, B_pad).
    xt = jnp.pad(x, ((0, b_pad - B), (0, 0))).T        # (in_dim, B_pad)

    full = lambda a: pl.BlockSpec(a.shape, lambda i: (0, 0))   # resident across grid

    out = pl.pallas_call(
        _mlp_kernel,
        out_shape=jax.ShapeDtypeStruct((out_dim, b_pad), jnp.float32),
        grid=(n_tiles,),
        in_specs=[
            pl.BlockSpec((in_dim, tb), lambda i: (0, i)),      # x tile streams
            full(w1t), full(b1t),
            full(w2t), full(b2t),
            full(w34t), full(b34t),
        ],
        out_specs=pl.BlockSpec((out_dim, tb), lambda i: (0, i)),
        compiler_params=pltpu.CompilerParams(
            dimension_semantics=("parallel",)),
    )(xt, w1t, b1t, w2t, b2t, w34t, b34t)

    return out[:, :B].T                                # (B, out_dim)


def init_params(key, input_dim, output_dim):
    """Deterministic init matching nn.Linear shapes (weights kept as (in, out))."""
    dims = [(input_dim, 64), (64, 32), (32, 16), (16, output_dim)]
    params = {}
    for i, (fan_in, fan_out) in enumerate(dims, start=1):
        key, kw, kb = jax.random.split(key, 3)
        bound = 1.0 / jnp.sqrt(jnp.float32(fan_in))
        params[f"w{i}"] = jax.random.uniform(
            kw, (fan_in, fan_out), jnp.float32, -bound, bound)
        params[f"b{i}"] = jax.random.uniform(
            kb, (1, fan_out), jnp.float32, -bound, bound)
    return params


if __name__ == "__main__":
    INPUT_DIM = 9    # ddarung features
    OUTPUT_DIM = 1   # regression target
    BATCH = 8

    key = jax.random.PRNGKey(0)
    key, kx = jax.random.split(key)
    x = jax.random.normal(kx, (BATCH, INPUT_DIM), jnp.float32)

    params = init_params(key, INPUT_DIM, OUTPUT_DIM)

    out = mymodel_forward(x, params)
    out = jax.block_until_ready(out)

    # Pure-JAX reference check (unfused math, batch-major, outside Pallas).
    h = jnp.maximum(x @ params["w1"] + params["b1"], 0.0)
    h = jnp.maximum(jax.nn.sigmoid(h @ params["w2"] + params["b2"]), 0.0)
    h = h @ params["w3"] + params["b3"]
    ref = h @ params["w4"] + params["b4"]
    assert out.shape == (BATCH, OUTPUT_DIM)
    assert jnp.allclose(out, ref, atol=1e-5, rtol=1e-5)

    print("KERNEL_OK")
</pallas_src>

<mosaic_0001>
module attributes {stable_mosaic.version = 11 : i64} {
  func.func @_mlp_kernel(%arg0: i32, %arg1: memref<9x128xf32, #tpu.memory_space<vmem>>, %arg2: memref<64x9xf32, #tpu.memory_space<vmem>>, %arg3: memref<64x1xf32, #tpu.memory_space<vmem>>, %arg4: memref<32x64xf32, #tpu.memory_space<vmem>>, %arg5: memref<32x1xf32, #tpu.memory_space<vmem>>, %arg6: memref<1x32xf32, #tpu.memory_space<vmem>>, %arg7: memref<1x1xf32, #tpu.memory_space<vmem>>, %arg8: memref<1x128xf32, #tpu.memory_space<vmem>>) attributes {dimension_semantics = [#tpu.dimension_semantics<parallel>], iteration_bounds = array<i64: 1>, scalar_prefetch = 0 : i64, scratch_operands = 0 : i64, tpu.core_type = #tpu.core_type<tc>, window_params = [{transform_indices = @transform_0, window_bounds = array<i64: 9, 128>}, {pipeline_mode = #tpu.pipeline_mode<synchronous>, transform_indices = @transform_1, window_bounds = array<i64: 64, 9>}, {pipeline_mode = #tpu.pipeline_mode<synchronous>, transform_indices = @transform_2, window_bounds = array<i64: 64, 1>}, {pipeline_mode = #tpu.pipeline_mode<synchronous>, transform_indices = @transform_3, window_bounds = array<i64: 32, 64>}, {pipeline_mode = #tpu.pipeline_mode<synchronous>, transform_indices = @transform_4, window_bounds = array<i64: 32, 1>}, {pipeline_mode = #tpu.pipeline_mode<synchronous>, transform_indices = @transform_5, window_bounds = array<i64: 1, 32>}, {pipeline_mode = #tpu.pipeline_mode<synchronous>, transform_indices = @transform_6, window_bounds = array<i64: 1, 1>}, {transform_indices = @transform_7, window_bounds = array<i64: 1, 128>}]} {
    %c0 = arith.constant 0 : index
    %c0_0 = arith.constant 0 : index
    %0 = vector.load %arg1[%c0, %c0_0] : memref<9x128xf32, #tpu.memory_space<vmem>>, vector<9x128xf32>
    %c0_1 = arith.constant 0 : index
    %c0_2 = arith.constant 0 : index
    %1 = vector.load %arg3[%c0_1, %c0_2] : memref<64x1xf32, #tpu.memory_space<vmem>>, vector<64x1xf32>
    %c0_3 = arith.constant 0 : index
    %c0_4 = arith.constant 0 : index
    %2 = vector.load %arg5[%c0_3, %c0_4] : memref<32x1xf32, #tpu.memory_space<vmem>>, vector<32x1xf32>
    %c0_5 = arith.constant 0 : index
    %c0_6 = arith.constant 0 : index
    %3 = vector.load %arg7[%c0_5, %c0_6] : memref<1x1xf32, #tpu.memory_space<vmem>>, vector<1x1xf32>
    %c0_7 = arith.constant 0 : index
    %c0_8 = arith.constant 0 : index
    %4 = vector.load %arg2[%c0_7, %c0_8] : memref<64x9xf32, #tpu.memory_space<vmem>>, vector<64x9xf32>
    %cst = arith.constant dense<0.000000e+00> : vector<64x128xf32>
    %5 = tpu.matmul %4, %0, %cst {dimension_numbers = #tpu.dot_dimension_numbers<[1], [0], [0], [1], [0, 0, 1, 1], [], []>} : vector<64x9xf32>, vector<9x128xf32>, vector<64x128xf32> -> vector<64x128xf32>
    %6 = vector.broadcast %1 : vector<64x1xf32> to vector<64x128xf32>
    %7 = arith.addf %5, %6 : vector<64x128xf32>
    %cst_9 = arith.constant 0.000000e+00 : f32
    %8 = vector.broadcast %cst_9 : f32 to vector<64x128xf32>
    %9 = arith.maximumf %7, %8 : vector<64x128xf32>
    %c0_10 = arith.constant 0 : index
    %c0_11 = arith.constant 0 : index
    %10 = vector.load %arg4[%c0_10, %c0_11] : memref<32x64xf32, #tpu.memory_space<vmem>>, vector<32x64xf32>
    %cst_12 = arith.constant dense<0.000000e+00> : vector<32x128xf32>
    %11 = tpu.matmul %10, %9, %cst_12 {dimension_numbers = #tpu.dot_dimension_numbers<[1], [0], [0], [1], [0, 0, 1, 1], [], []>} : vector<32x64xf32>, vector<64x128xf32>, vector<32x128xf32> -> vector<32x128xf32>
    %12 = vector.broadcast %2 : vector<32x1xf32> to vector<32x128xf32>
    %13 = arith.addf %11, %12 : vector<32x128xf32>
    %14 = arith.negf %13 : vector<32x128xf32>
    %15 = math.exp %14 : vector<32x128xf32>
    %cst_13 = arith.constant 1.000000e+00 : f32
    %16 = vector.broadcast %cst_13 : f32 to vector<32x128xf32>
    %17 = arith.addf %16, %15 : vector<32x128xf32>
    %18 = arith.divf %16, %17 : vector<32x128xf32>
    %c0_14 = arith.constant 0 : index
    %c0_15 = arith.constant 0 : index
    %19 = vector.load %arg6[%c0_14, %c0_15] : memref<1x32xf32, #tpu.memory_space<vmem>>, vector<1x32xf32>
    %cst_16 = arith.constant dense<0.000000e+00> : vector<1x128xf32>
    %20 = tpu.matmul %19, %18, %cst_16 {dimension_numbers = #tpu.dot_dimension_numbers<[1], [0], [0], [1], [0, 0, 1, 1], [], []>} : vector<1x32xf32>, vector<32x128xf32>, vector<1x128xf32> -> vector<1x128xf32>
    %21 = vector.broadcast %3 : vector<1x1xf32> to vector<1x128xf32>
    %22 = arith.addf %20, %21 : vector<1x128xf32>
    %c0_17 = arith.constant 0 : index
    %c0_18 = arith.constant 0 : index
    %23 = vector.load %arg8[%c0_17, %c0_18] : memref<1x128xf32, #tpu.memory_space<vmem>>, vector<1x128xf32>
    tpu.vector_store %arg8[%c0_17, %c0_18], %22 {strides = array<i32>} : memref<1x128xf32, #tpu.memory_space<vmem>>, vector<1x128xf32>,
    return
  }
  func.func @transform_0(%arg0: i32) -> (i32, i32) {
    %c0_i32 = arith.constant 0 : i32
    %c0_i32_0 = arith.constant 0 : i32
    return %c0_i32, %arg0 : i32, i32
  }
  func.func @transform_1(%arg0: i32) -> (i32, i32) {
    %c0_i32 = arith.constant 0 : i32
    %c0_i32_0 = arith.constant 0 : i32
    %c0_i32_1 = arith.constant 0 : i32
    return %c0_i32, %c0_i32_0 : i32, i32
  }
  func.func @transform_2(%arg0: i32) -> (i32, i32) {
    %c0_i32 = arith.constant 0 : i32
    %c0_i32_0 = arith.constant 0 : i32
    %c0_i32_1 = arith.constant 0 : i32
    return %c0_i32, %c0_i32_0 : i32, i32
  }
  func.func @transform_3(%arg0: i32) -> (i32, i32) {
    %c0_i32 = arith.constant 0 : i32
    %c0_i32_0 = arith.constant 0 : i32
    %c0_i32_1 = arith.constant 0 : i32
    return %c0_i32, %c0_i32_0 : i32, i32
  }
  func.func @transform_4(%arg0: i32) -> (i32, i32) {
    %c0_i32 = arith.constant 0 : i32
    %c0_i32_0 = arith.constant 0 : i32
    %c0_i32_1 = arith.constant 0 : i32
    return %c0_i32, %c0_i32_0 : i32, i32
  }
  func.func @transform_5(%arg0: i32) -> (i32, i32) {
    %c0_i32 = arith.constant 0 : i32
    %c0_i32_0 = arith.constant 0 : i32
    %c0_i32_1 = arith.constant 0 : i32
    return %c0_i32, %c0_i32_0 : i32, i32
  }
  func.func @transform_6(%arg0: i32) -> (i32, i32) {
    %c0_i32 = arith.constant 0 : i32
    %c0_i32_0 = arith.constant 0 : i32
    %c0_i32_1 = arith.constant 0 : i32
    return %c0_i32, %c0_i32_0 : i32, i32
  }
  func.func @transform_7(%arg0: i32) -> (i32, i32) {
    %c0_i32 = arith.constant 0 : i32
    %c0_i32_0 = arith.constant 0 : i32
    return %c0_i32, %arg0 : i32, i32
  }
}

</mosaic_0001>

<bundles_post_ra>
// kernel: tpu_custom_call.1
= control target key start
LH: loop header
LB: loop body
LE: loop exit
PB: predicated region body
PF: predicated region fallthrough
CT: control target
= control target key end

     0   :  { %s803_s0 = inlined_call_operand.vmem [shape: f32[9,128], index: 0, kind: input, shape index: {}]   ;;  %s804_s1 = inlined_call_operand.vmem [shape: f32[64,9], index: 1, kind: input, shape index: {}]   ;;  %s805_s2 = inlined_call_operand.vmem [shape: f32[64,1], index: 2, kind: input, shape index: {}]   ;;  %s806_s3 = inlined_call_operand.vmem [shape: f32[32,64], index: 3, kind: input, shape index: {}]   ;;  %s807_s4 = inlined_call_operand.vmem [shape: f32[32,1], index: 4, kind: input, shape index: {}]   ;;  %s808_s5 = inlined_call_operand.vmem [shape: f32[1,32], index: 5, kind: input, shape index: {}]   ;;  %s809_s6 = inlined_call_operand.<no memory space> [shape: f32[1,1], index: 6, kind: input, shape index: {}]   ;;  %s810_s7 = inlined_call_operand.hbm [shape: f32[1,128], index: 7, kind: output, shape index: {}]  }
   0x1   :  { %v12_v0 = vstv %s809_s6 }
   0x2   :  { %13 = vst [vmem:[#allocation2] sm:$0x1] %v12_v0 }
   0x3   :  { %v29_v1 = vld [vmem:[%s803_s0] sm:$0xff]  ;;  %v30_v2 = vld [vmem:[%s803_s0 + $0x8] sm:$0x1]  ;;  %vm117_vm0 = vcmask 1040384   ;;  %vm649_vm1 = vmmov 1   ;;  %vm92_vm3 = vcmask 72704  }
   0x4   :  { %v44_v3 = vld [vmem:[%s804_s1] sm:$0xff]  ;;  %v573_v4 = vpack.c.bf16 %v30_v2, %v29_v1  ;;  %vm574_vm2 = vmpackc.low %vm117_vm0, %vm649_vm1  ;;  %v650_v5 = vmov 0   ;;  %v45_v7 = vld [vmem:[%s804_s1 + $0x8] sm:$0xff] }
   0x5   :  { %528 = vmatprep.mubr.msk.f32.mxu0 %vm92_vm3, %v44_v3  ;;  %607 = vset.pattern.permute.xlu0 %v650_v5  ;;  %v31_v6 = vld [vmem:[%s805_s2] sm:$0xff]  ;;  %v33_v8 = vld [vmem:[%s805_s2 + $0x10] sm:$0xff]  ;;  %v32_v10 = vld [vmem:[%s805_s2 + $0x8] sm:$0xff] }
   0x6   :  { %575 = vmatprep.subr.msk.bf16.mxu0 %vm574_vm2, %v573_v4  ;;  %608 = vset.pattern.permute.xlu1 %v650_v5  ;;  %v46_v9 = vld [vmem:[%s804_s1 + $0x10] sm:$0xff]  ;;  %v34_v11 = vld [vmem:[%s805_s2 + $0x18] sm:$0xff] }
   0x7   :  { %578 = vmatpush3.bf16.msk.msra.mxu0 %vm574_vm2, %v573_v4  ;;  %54 = vperm.xlu0 %607, %v31_v6   ;;  %v47_v12 = vld [vmem:[%s804_s1 + $0x18] sm:$0xff] }
   0x8   :  { %64 = vperm.xlu1 %608, %v33_v8  }
   0xa   :  { %529 = vmatmul.mubr.msk.f32.vlgmr.msra.gmra.mrb[0].mxu0 %vm92_vm3, %v45_v7 }
   0xb   :  { %531 = vmatprep.mubr.msk.f32.mxu0 %vm92_vm3, %v46_v9  ;;  %59 = vperm.xlu0 %607, %v32_v10  }
   0xc   :  { %14 = vsyncpa [#allocation4], 0  ;;  %v48_v13 = vld [vmem:[%s804_s1 + $0x20] sm:$0xff]  ;;  %69 = vperm.xlu1 %608, %v34_v11   ;;  %v36_v15 = vld [vmem:[%s805_s2 + $0x28] sm:$0xff]  ;;  %vm258_vm4 = vcmask 523264   ;;  %v651_v2 = vmov 0.0|0.0  }
   0xd   :  { %v35_v14 = vld [vmem:[%s805_s2 + $0x20] sm:$0xff]  ;;  %v49_v16 = vld [vmem:[%s804_s1 + $0x28] sm:$0xff]  ;;  %v50_v17 = vld [vmem:[%s804_s1 + $0x30] sm:$0xff]  ;;  %595 = vmatprep.subr.bf16.mxu0 %v651_v2  ;;  %vm652_vm5 = vmmov 0   ;;  %v653_v3 = vmov 0.0   ;;  %vm390_vm6 = vcmask 261120  }
   0xe   :  { %532 = vmatmul.mubr.msk.f32.gmra.mrb[2].mxu0 %vm92_vm3, %v47_v12  ;;  %v37_v18 = vld [vmem:[%s805_s2 + $0x30] sm:$0xff]  ;;  %v38_v19 = vld [vmem:[%s805_s2 + $0x38] sm:$0xff]  ;;  %v39_v21 = vld [vmem:[%s807_s4] sm:$0xff]  ;;  %s654_s26 = smov [#allocation3]  }
   0xf   :  { %534 = vmatprep.mubr.msk.f32.mxu0 %vm92_vm3, %v48_v13  ;;  %74 = vperm.xlu0 %607, %v35_v14   ;;  %v51_v20 = vld [vmem:[%s804_s1 + $0x38] sm:$0xff]  ;;  %v40_v22 = vld [vmem:[%s807_s4 + $0x8] sm:$0xff]  ;;  %v41_v23 = vld [vmem:[%s807_s4 + $0x10] sm:$0xff]  ;;  %s471_s27 = sshll.u32 %s654_s26, 4  ;;  %s472_s27 = int_to_ptr.vmem [resolvable:$true] %s471_s27 }
  0x10   :  { %79 = vperm.xlu1 %608, %v36_v15   ;;  %v42_v24 = vld [vmem:[%s807_s4 + $0x18] sm:$0xff]  ;;  %v43_v25 = vld [vmem:[#allocation2] sm:$0x1]  ;;  %v235_v63 = vld [vmem:[%s806_s3 + $0x8] sm:$0xff]  ;;  %s625_s28 = scalar_lea.vmem %s472_s27, 16  ;;  %s629_s29 = scalar_lea.vmem %s472_s27, 32 }
  0x11   :  { %v234_v26 = vld [vmem:[%s806_s3] sm:$0xff]  ;;  %v236_v0 = vld [vmem:[%s806_s3 + $0x10] sm:$0xff]  ;;  %v237_v1 = vld [vmem:[%s806_s3 + $0x18] sm:$0xff]  ;;  %p626_p0 = scmp.ne.s32.totalorder %s472_s27, %s625_s28  ;;  %p630_p1 = scmp.lt.s32.totalorder %s472_s27, %s472_s27 }
  0x12   :  { %535 = vmatmul.mubr.msk.f32.gmra.mrb[4].mxu0 %vm92_vm3, %v49_v16  ;;  %556 = vmatprep.mubr.msk.f32.mxu1 %vm258_vm4, %v234_v26  ;;  %p631_p2 = scmp.lt.s32.totalorder %s629_s29, %s625_s28 }
  0x13   :  { %537 = vmatprep.mubr.msk.f32.mxu0 %vm92_vm3, %v50_v17  ;;  %84 = vperm.xlu0 %607, %v37_v18  }
  0x14   :  { %89 = vperm.xlu1 %608, %v38_v19   ;;  %p632_p3 = por %p631_p2, %p630_p1 }
  0x16   :  { %538 = vmatmul.mubr.msk.f32.gmra.mrb[6].mxu0 %vm92_vm3, %v51_v20  ;;  %p633_p4 = pnand %p632_p3, %p626_p0 }
  0x17   :  { %240 = vperm.xlu0 %607, %v39_v21   ;;  %570 = vmatprep.mubr.msk.f32.mxu0 %vm652_vm5, %v653_v3 }
  0x18   :  { %245 = vperm.xlu1 %608, %v40_v22  }
  0x1b   :  { %250 = vperm.xlu0 %607, %v41_v23  }
  0x1c   :  { %255 = vperm.xlu1 %608, %v42_v24  }
  0x1f   :  { %383 = vperm.xlu0 %607, %v43_v25  }
  0x86   :  { %v55_v27 = vpop.permute.xlu0 %54 }
  0x87   :  { %v65_v28 = vpop.permute.xlu1 %64 }
  0x8a   :  { %v60_v29 = vpop.permute.xlu0 %59 }
  0x8b   :  { %v70_v30 = vpop.permute.xlu1 %69 }
  0x8e   :  { %v75_v43 = vpop.permute.xlu0 %74 }
  0x8f   :  { %v80_v40 = vpop.permute.xlu1 %79 }
  0x92   :  { %v85_v55 = vpop.permute.xlu0 %84 }
  0x93   :  { %v90_v52 = vpop.permute.xlu1 %89 }
  0x96   :  { %v241_v5 = vpop.permute.xlu0 %240 }
  0x97   :  { %v246_v4 = vpop.permute.xlu1 %245 }
  0x9a   :  { %v251_v14 = vpop.permute.xlu0 %250 }
  0x9b   :  { %v256_v11 = vpop.permute.xlu1 %255 }
  0xdd   :  { %v530_v31 = vpop.f32.mrb[0].mxu0 }
  0xde   :  { %v193_v32 = vadd.f32 %v530_v31, %v60_v29  ;;  %v187_v33 = vpop.f32.mrb[1].mxu0 }
  0xdf   :  { %v188_v34 = vadd.f32 %v187_v33, %v55_v27 }
  0xe0   :  { %v227_v35 = vmax.f32 %v193_v32, 0.0 }
  0xe1   :  { %v226_v36 = vmax.f32 %v188_v34, 0.0  ;;  %v533_v37 = vpop.f32.mrb[2].mxu0  ;;  %v380_v34 = vld [vmem:[%s808_s5] sm:$0x1] }
  0xe2   :  { %v203_v38 = vadd.f32 %v533_v37, %v70_v30  ;;  %v197_v39 = vpop.f32.mrb[3].mxu0 }
  0xe3   :  { %v198_v41 = vadd.f32 %v197_v39, %v65_v28  ;;  %v579_v42 = vpack.c.bf16 %v227_v35, %v226_v36  ;;  %v386_v35 = vlaneseq }
  0xe4   :  { %v229_v44 = vmax.f32 %v203_v38, 0.0  ;;  %v384_v38 = vpop.permute.xlu0 %383 }
  0xe5   :  { %v228_v45 = vmax.f32 %v198_v41, 0.0  ;;  %v536_v46 = vpop.f32.mrb[4].mxu0  ;;  %580 = vmatprep.subr.bf16.mxu1 %v579_v42  ;;  %v387_v36 = vshrl.u32 %v386_v35, 7 }
  0xe6   :  { %v213_v47 = vadd.f32 %v536_v46, %v80_v40  ;;  %v207_v48 = vpop.f32.mrb[5].mxu0  ;;  %582 = vmatpush3.bf16.msra.mxu1 %v579_v42 }
  0xe7   :  { %v583_v49 = vpack.c.bf16 %v229_v44, %v228_v45  ;;  %v208_v50 = vadd.f32 %v207_v48, %v75_v43  ;;  %v388_v37 = vsub.s32 0, %v387_v36 }
  0xe8   :  { %v231_v51 = vmax.f32 %v213_v47, 0.0 }
  0xe9   :  { %v230_v53 = vmax.f32 %v208_v50, 0.0  ;;  %v539_v54 = vpop.f32.mrb[6].mxu0  ;;  %584 = vmatprep.subr.bf16.mxu1 %v583_v49  ;;  %v389_v39 = vrot.slane %v384_v38, %v388_v37 }
  0xea   :  { %v223_v56 = vadd.f32 %v539_v54, %v90_v52  ;;  %v217_v57 = vpop.f32.mrb[7].mxu0  ;;  %586 = vmatpush3.bf16.msra.mxu1 %v583_v49 }
  0xeb   :  { %v587_v58 = vpack.c.bf16 %v231_v51, %v230_v53  ;;  %v218_v59 = vadd.f32 %v217_v57, %v85_v55 }
  0xec   :  { %v233_v60 = vmax.f32 %v223_v56, 0.0 }
  0xed   :  { %v232_v61 = vmax.f32 %v218_v59, 0.0  ;;  %588 = vmatprep.subr.bf16.mxu1 %v587_v58 }
  0xee   :  { %590 = vmatpush3.bf16.msra.mxu1 %v587_v58 }
  0xef   :  { %v591_v62 = vpack.c.bf16 %v233_v60, %v232_v61 }
  0xf1   :  { %592 = vmatprep.subr.bf16.mxu1 %v591_v62 }
  0xf2   :  { %594 = vmatpush3.bf16.msra.mxu1 %v591_v62 }
  0xf5   :  { %557 = vmatmul.mubr.msk.f32.vlgmr.msra.gmra.mrb[0].mxu1 %vm258_vm4, %v235_v63 }
  0xf6   :  { %559 = vmatprep.mubr.msk.f32.mxu1 %vm258_vm4, %v236_v0 }
  0xf9   :  { %560 = vmatmul.mubr.msk.f32.gmra.mrb[2].mxu1 %vm258_vm4, %v237_v1 }
 0x1c8   :  { %v558_v6 = vpop.f32.mrb[0].mxu1 }
 0x1c9   :  { %v343_v7 = vadd.f32 %v558_v6, %v246_v4  ;;  %v337_v8 = vpop.f32.mrb[1].mxu1 }
 0x1ca   :  { %v338_v9 = vadd.f32 %v337_v8, %v241_v5 }
 0x1cb   :  { %v493_v10 = vmul.f32 -1.442695, %v343_v7 }
 0x1cc   :  { %v492_v12 = vmul.f32 -1.442695, %v338_v9  ;;  %v561_v13 = vpop.f32.mrb[2].mxu1 }
 0x1cd   :  { %609 = vpow2.f32 %v493_v10  ;;  %v353_v15 = vadd.f32 %v561_v13, %v256_v11  ;;  %v347_v16 = vpop.f32.mrb[3].mxu1 }
 0x1ce   :  { %611 = vpow2.f32 %v492_v12  ;;  %v348_v17 = vadd.f32 %v347_v16, %v251_v14 }
 0x1cf   :  { %v495_v18 = vmul.f32 -1.442695, %v353_v15 }
 0x1d0   :  { %v494_v19 = vmul.f32 -1.442695, %v348_v17 }
 0x1d1   :  { %613 = vpow2.f32 %v495_v18 }
 0x1d2   :  { %615 = vpow2.f32 %v494_v19 }
 0x1d7   :  { %v610_v20 = vpop.eup %609 }
 0x1d8   :  { %v612_v21 = vpop.eup %611  ;;  %v369_v22 = vadd.f32 1.0, %v610_v20 }
 0x1d9   :  { %v368_v23 = vadd.f32 1.0, %v612_v21 }
 0x1da   :  { %617 = vrcp.f32 %v369_v22 }
 0x1db   :  { %v614_v24 = vpop.eup %613  ;;  %619 = vrcp.f32 %v368_v23 }
 0x1dc   :  { %v616_v25 = vpop.eup %615  ;;  %v371_v26 = vadd.f32 1.0, %v614_v24 }
 0x1dd   :  { %v370_v27 = vadd.f32 1.0, %v616_v25 }
 0x1de   :  { %621 = vrcp.f32 %v371_v26 }
 0x1df   :  { %623 = vrcp.f32 %v370_v27 }
 0x1e4   :  { %v618_v28 = vpop.eup %617 }
 0x1e5   :  { %v620_v29 = vpop.eup %619 }
 0x1e6   :  { %v596_v30 = vpack.c.bf16 %v618_v28, %v620_v29 }
 0x1e8   :  { %v622_v31 = vpop.eup %621  ;;  %597 = vmatpush3.bf16.msra.mxu0 %v596_v30 }
 0x1e9   :  { %v624_v32 = vpop.eup %623  ;;  %598 = vmatprep.subr.bf16.mxu0 %v651_v2 }
 0x1ea   :  { %v599_v33 = vpack.c.bf16 %v622_v31, %v624_v32 }
 0x1ec   :  { %600 = vmatpush3.bf16.msra.mxu0 %v599_v33 }
 0x1ef   :  { %571 = vmatmul.mubr.msk.f32.vlgmr.msra.gmra.mrb[8].mxu0 %vm390_vm6, %v380_v34 }
 0x2c2   :  { %v460_v40 = vpop.f32.mrb[8].mxu0 }
 0x2c3   :  { %v461_v41 = vadd.f32 %v460_v40, %v389_v39  ;;  %v572_v42 = vpop.f32.mrb[9].mxu0 }
 0x2c5   :  { %464 = vst [vmem:[#allocation3] sm:$0x1] %v461_v41 }
 0x2c6   :  { %636 = shalt.err (!%p633_p4)
}
 0x2c7   :  { %s637_s8 = scalar_lea.hbm %s810_s7, 16 }
 0x2c8   :  { %p638_p5 = scmp.ne.s32.totalorder %s810_s7, %s637_s8  ;;  %p641_p6 = scmp.lt.u32.totalorder %s637_s8, %s810_s7 }
 0x2ca   :  { %p643_p7 = pnand %p641_p6, %p638_p5 }
 0x2cc   :  { %646 = shalt.err (!%p643_p7)
}
 0x2cd   :  { %474 = dma.vmem_to_hbm [thread:$0]  %s472_s27, 16, %s810_s7, [#allocation4]  }
 0x2ce   :  { %647 = dma.done.wait [#allocation4], 16  }
 0x2cf   :  { %648 = vsyncadd [#allocation4], 4294967280 }
 0x2d0   :  { %478 = vsyncpa [#allocation4], 1 }

</bundles_post_ra>
